<compile_context>
chip_gen: v6e
topology: v6e:2x2x1
jax: 0.10.0
libtpu: 0.0.40
codegen_flags: <defaults>
</compile_context>

<pallas_src>
import functools

import jax
import jax.numpy as jnp
from jax.experimental import pallas as pl
from jax.experimental.pallas import tpu as pltpu

_LATENT = 16   # fixed by the module (encoder bottleneck width)
_LANE = 128
_SUBLANE = 8


def _round_up(x, m):
    return (x + m - 1) // m * m


def _cdiv(a, b):
    return -(-a // b)


def _choose_batch_tiling(batch, tm_cap):
    """Pick (TM, padded_batch, grid_steps).

    Prefers >= 2 (even) grid steps so both v7x TensorCores get work while
    keeping TM large (<= tm_cap) and batch padding minimal
    (e.g. batch=272 -> TM=136, grid=2, zero padded rows).
    """
    b8 = _round_up(batch, _SUBLANE)
    if b8 < 2 * _SUBLANE:
        n = 1
    elif b8 <= 2 * tm_cap:
        n = 2
    else:
        n = _cdiv(b8, tm_cap)
        if n % 2:
            n += 1                      # even step count for the 2-TC split
    tm = _round_up(_cdiv(b8, n), _SUBLANE)
    return tm, tm * n, n


def _ood_kernel(x_ref, *refs, relu_flags, inv_feature_count, with_y,
                lane_dense_loss):
    n_layers = len(relu_flags)
    w_refs = refs[:n_layers]
    b_refs = refs[n_layers:2 * n_layers]
    out_refs = refs[2 * n_layers:]
    if with_y:
        y_ref, loss_ref = out_refs
    else:
        (loss_ref,) = out_refs

    x_bf = x_ref[...]                       # (TM, Din_p) bf16
    x32 = x_bf.astype(jnp.float32)          # residual / loss path stays f32

    h = x_bf
    z = None
    for li in range(n_layers):
        # bf16 operands on the MXU, f32 accumulate, f32 bias add / ReLU
        z = jnp.dot(h, w_refs[li][...],
                    preferred_element_type=jnp.float32) + b_refs[li][...]
        if relu_flags[li]:
            z = jnp.maximum(z, 0.0)
        if li + 1 < n_layers:
            h = z.astype(jnp.bfloat16)

    if with_y:
        y_ref[...] = z.astype(y_ref.dtype)

    # Fused per-sample reconstruction loss. Padded feature columns of both x
    # and y are exactly zero, so the sum only covers real features.
    d = z - x32
    if lane_dense_loss:
        loss_row = jnp.sum(d * d, axis=-1) * inv_feature_count        # (TM,)
        loss_ref[...] = jax.lax.broadcast_in_dim(loss_row, loss_ref.shape, (2,))
    else:
        loss_ref[...] = (jnp.sum(d * d, axis=-1, keepdims=True)
                         * inv_feature_count)


def ood_detector_forward(x, params, *, tm_cap=512, return_y=True,
                         y_dtype=jnp.bfloat16):
    """x: [batch, input_dim] f32. params: dict w1,b1,...,w4,b4 (f32, [in,out]).

    Returns (y, recon_loss): y [batch, input_dim] (y_dtype, None if
    return_y=False), recon_loss [batch] f32 == mean((y - x)**2, axis=1).
    """
    batch, input_dim = x.shape
    hidden_dim = params["w1"].shape[1]
    latent_dim = params["w2"].shape[1]

    # per-dim lane-dense padded widths
    din_p = _round_up(input_dim, _LANE)
    dh_p = _round_up(hidden_dim, _LANE)
    dl_p = _round_up(latent_dim, _LANE)
    tm, bp, grid_m = _choose_batch_tiling(batch, tm_cap)

    # ---- host-side (XLA glue) parameter prep: (conditionally) fuse, pad, cast
    def pad_w(w, rows, cols):
        return jnp.pad(w, ((0, rows - w.shape[0]),
                           (0, cols - w.shape[1]))).astype(jnp.bfloat16)

    def pad_b(b, cols):
        b = b.reshape(1, -1)
        return jnp.pad(b, ((0, 0), (0, cols - b.shape[1]))).astype(jnp.float32)

    # W2@W3 fusion only pays while Dh_p^2 <= 2 * 128 * Dh_p (i.e. Dh_p <= 256)
    fuse_latent = dh_p <= 256
    if fuse_latent:
        w23 = params["w2"] @ params["w3"]                 # (hidden, hidden) f32
        b23 = params["b2"] @ params["w3"] + params["b3"]  # (hidden,) f32
        weights = (pad_w(params["w1"], din_p, dh_p),
                   pad_w(w23, dh_p, dh_p),
                   pad_w(params["w4"], dh_p, din_p))
        biases = (pad_b(params["b1"], dh_p),
                  pad_b(b23, dh_p),
                  pad_b(params["b4"], din_p))
        relu_flags = (True, True, False)
    else:
        weights = (pad_w(params["w1"], din_p, dh_p),
                   pad_w(params["w2"], dh_p, dl_p),
                   pad_w(params["w3"], dl_p, dh_p),
                   pad_w(params["w4"], dh_p, din_p))
        biases = (pad_b(params["b1"], dh_p),
                  pad_b(params["b2"], dl_p),
                  pad_b(params["b3"], dh_p),
                  pad_b(params["b4"], din_p))
        relu_flags = (True, False, True, False)

    x_pad = jnp.pad(x, ((0, bp - batch),
                        (0, din_p - input_dim))).astype(jnp.bfloat16)

    y_itemsize = jnp.dtype(y_dtype).itemsize

    # ---- generation-aware VMEM budget from the actual buffer plan ----
    try:
        vmem_cap = int(pltpu.get_tpu_info().vmem_capacity_bytes)
    except Exception:
        vmem_cap = 64 << 20   # conservative (v7x-sized) default

    def vmem_need(weight_bufs):
        wb = sum(w.shape[0] * w.shape[1] for w in weights) * 2 * weight_bufs
        bb = sum(b.shape[1] for b in biases) * 4 * weight_bufs
        xb = 2 * tm * din_p * 2                              # x, double-buffered
        yb = (2 * tm * din_p * y_itemsize) if return_y else 0
        lb = 2 * _SUBLANE * tm * 4                           # loss tile
        return wb + bb + xb + yb + lb

    # ---- CostEstimate for the actual padded / fused work ----
    flops = 2 * bp * sum(w.shape[0] * w.shape[1] for w in weights)
    bytes_accessed = (bp * din_p * 2
                      + sum(int(w.size) for w in weights) * 2
                      + sum(int(b.size) for b in biases) * 4
                      + (bp * din_p * y_itemsize if return_y else 0)
                      + grid_m * _SUBLANE * tm * 4)

    def run(single_buffer_weights, lane_dense_loss):
        kernel = functools.partial(
            _ood_kernel,
            relu_flags=relu_flags,
            inv_feature_count=1.0 / float(input_dim),
            with_y=return_y,
            lane_dense_loss=lane_dense_loss)

        resident = ({"pipeline_mode": pl.Buffered(1)}
                    if single_buffer_weights else {})
        in_specs = [pl.BlockSpec((tm, din_p), lambda i: (i, 0))]          # x
        in_specs += [pl.BlockSpec(w.shape, lambda i: (0, 0), **resident)  # W*
                     for w in weights]
        in_specs += [pl.BlockSpec(b.shape, lambda i: (0, 0), **resident)  # b*
                     for b in biases]

        out_shape, out_specs = [], []
        if return_y:
            out_shape.append(jax.ShapeDtypeStruct((bp, din_p), y_dtype))
            out_specs.append(pl.BlockSpec((tm, din_p), lambda i: (i, 0)))
        if lane_dense_loss:
            out_shape.append(jax.ShapeDtypeStruct((grid_m, _SUBLANE, tm),
                                                  jnp.float32))
            out_specs.append(pl.BlockSpec((1, _SUBLANE, tm),
                                          lambda i: (i, 0, 0)))
        else:
            out_shape.append(jax.ShapeDtypeStruct((bp, 1), jnp.float32))
            out_specs.append(pl.BlockSpec((tm, 1), lambda i: (i, 0)))

        wbufs = 1 if single_buffer_weights else 2
        vmem_limit = int(min(0.75 * vmem_cap,
                             max(vmem_need(wbufs) + (8 << 20), 32 << 20)))

        outs = pl.pallas_call(
            kernel,
            out_shape=tuple(out_shape),
            grid=(grid_m,),
            in_specs=in_specs,
            out_specs=tuple(out_specs),
            compiler_params=pltpu.CompilerParams(
                dimension_semantics=("parallel",),
                vmem_limit_bytes=vmem_limit),
            cost_estimate=pl.CostEstimate(flops=flops, transcendentals=0,
                                          bytes_accessed=bytes_accessed),
        )(x_pad, *weights, *biases)

        if return_y:
            y_pad, loss_pad = outs
            y_out = y_pad[:batch, :input_dim]
        else:
            (loss_pad,) = outs
            y_out = None
        if lane_dense_loss:
            loss = loss_pad[:, 0, :].reshape(-1)[:batch]
        else:
            loss = loss_pad[:batch, 0]
        return y_out, loss

    try:
        return run(single_buffer_weights=True, lane_dense_loss=True)
    except Exception:
        # Conservative fallback if this JAX build rejects pl.Buffered(1)
        # single-buffering or the lane-dense loss relayout.
        return run(single_buffer_weights=False, lane_dense_loss=False)


def init_params(key, input_dim, hidden_dim, latent_dim=_LATENT):
    """Deterministic synthetic parameters. Weights stored [in, out], f32."""
    ks = jax.random.split(key, 8)

    def lin(kw, kb, fan_in, fan_out):
        bound = 1.0 / jnp.sqrt(fan_in)          # PyTorch Linear default init
        w = jax.random.uniform(kw, (fan_in, fan_out), jnp.float32, -bound, bound)
        b = jax.random.uniform(kb, (fan_out,), jnp.float32, -bound, bound)
        return w, b

    w1, b1 = lin(ks[0], ks[1], input_dim, hidden_dim)    # encoder layer 1
    w2, b2 = lin(ks[2], ks[3], hidden_dim, latent_dim)   # encoder layer 2
    w3, b3 = lin(ks[4], ks[5], latent_dim, hidden_dim)   # decoder layer 1
    w4, b4 = lin(ks[6], ks[7], hidden_dim, input_dim)    # decoder layer 2
    return dict(w1=w1, b1=b1, w2=w2, b2=b2, w3=w3, b3=b3, w4=w4, b4=b4)


def reference_forward(x, p):
    h1 = jnp.maximum(x @ p["w1"] + p["b1"], 0.0)
    z = h1 @ p["w2"] + p["b2"]
    h2 = jnp.maximum(z @ p["w3"] + p["b3"], 0.0)
    return h2 @ p["w4"] + p["b4"]


if __name__ == "__main__":
    key = jax.random.PRNGKey(0)
    k_param, k_x, k_param2, k_x2 = jax.random.split(key, 4)

    # --- small shape consistent with the module ---
    batch, input_dim, hidden_dim = 8, 32, 32
    params = init_params(k_param, input_dim, hidden_dim)
    x = jax.random.normal(k_x, (batch, input_dim), jnp.float32)

    y, recon_loss = ood_detector_forward(x, params)
    jax.block_until_ready((y, recon_loss))

    y_ref = reference_forward(x, params)
    loss_ref = jnp.mean((y_ref - x) ** 2, axis=1)
    assert y.shape == (batch, input_dim)
    assert recon_loss.shape == (batch,)
    # bf16 x / weights / y -> relaxed tolerance vs the f32 reference
    assert jnp.allclose(y.astype(jnp.float32), y_ref, atol=2e-2, rtol=2e-2)
    assert jnp.allclose(recon_loss, loss_ref, atol=2e-2, rtol=2e-2)

    # --- loss-only path (typical OOD scoring): y writeback elided ---
    _, loss_only = ood_detector_forward(x, params, return_y=False)
    jax.block_until_ready(loss_only)
    assert jnp.allclose(loss_only, loss_ref, atol=2e-2, rtol=2e-2)

    # --- second shape: ragged dims + 2-step, zero-padding batch grid
    #     (exercises per-dim padding and the resident-weight path) ---
    batch2, input_dim2, hidden_dim2 = 272, 40, 24
    params2 = init_params(k_param2, input_dim2, hidden_dim2)
    x2 = jax.random.normal(k_x2, (batch2, input_dim2), jnp.float32)
    y2, loss2 = ood_detector_forward(x2, params2)
    jax.block_until_ready((y2, loss2))

    y2_ref = reference_forward(x2, params2)
    loss2_ref = jnp.mean((y2_ref - x2) ** 2, axis=1)
    assert y2.shape == (batch2, input_dim2)
    assert loss2.shape == (batch2,)
    assert jnp.allclose(y2.astype(jnp.float32), y2_ref, atol=2e-2, rtol=2e-2)
    assert jnp.allclose(loss2, loss2_ref, atol=2e-2, rtol=2e-2)

    print("KERNEL_OK")
</pallas_src>

<mosaic_0001>
module attributes {stable_mosaic.version = 11 : i64} {
  func.func @_ood_kernel(%arg0: i32, %arg1: memref<8x128xbf16, #tpu.memory_space<vmem>>, %arg2: memref<128x128xbf16, #tpu.memory_space<vmem>>, %arg3: memref<128x128xbf16, #tpu.memory_space<vmem>>, %arg4: memref<128x128xbf16, #tpu.memory_space<vmem>>, %arg5: memref<1x128xf32, #tpu.memory_space<vmem>>, %arg6: memref<1x128xf32, #tpu.memory_space<vmem>>, %arg7: memref<1x128xf32, #tpu.memory_space<vmem>>, %arg8: memref<8x128xbf16, #tpu.memory_space<vmem>>, %arg9: memref<1x8x8xf32, #tpu.memory_space<vmem>>) attributes {dimension_semantics = [#tpu.dimension_semantics<parallel>], iteration_bounds = array<i64: 1>, scalar_prefetch = 0 : i64, scratch_operands = 0 : i64, tpu.core_type = #tpu.core_type<tc>, window_params = [{transform_indices = @transform_0, window_bounds = array<i64: 8, 128>}, {pipeline_mode = #tpu.pipeline_mode<synchronous>, transform_indices = @transform_1, window_bounds = array<i64: 128, 128>}, {pipeline_mode = #tpu.pipeline_mode<synchronous>, transform_indices = @transform_2, window_bounds = array<i64: 128, 128>}, {pipeline_mode = #tpu.pipeline_mode<synchronous>, transform_indices = @transform_3, window_bounds = array<i64: 128, 128>}, {pipeline_mode = #tpu.pipeline_mode<synchronous>, transform_indices = @transform_4, window_bounds = array<i64: 1, 128>}, {pipeline_mode = #tpu.pipeline_mode<synchronous>, transform_indices = @transform_5, window_bounds = array<i64: 1, 128>}, {pipeline_mode = #tpu.pipeline_mode<synchronous>, transform_indices = @transform_6, window_bounds = array<i64: 1, 128>}, {transform_indices = @transform_7, window_bounds = array<i64: 8, 128>}, {transform_indices = @transform_8, window_bounds = array<i64: 1, 8, 8>}]} {
    %c0 = arith.constant 0 : index
    %c0_0 = arith.constant 0 : index
    %0 = vector.load %arg1[%c0, %c0_0] : memref<8x128xbf16, #tpu.memory_space<vmem>>, vector<8x128xbf16>
    %1 = arith.extf %0 : vector<8x128xbf16> to vector<8x128xf32>
    %c0_1 = arith.constant 0 : index
    %c0_2 = arith.constant 0 : index
    %2 = vector.load %arg2[%c0_1, %c0_2] : memref<128x128xbf16, #tpu.memory_space<vmem>>, vector<128x128xbf16>
    %cst = arith.constant dense<0.000000e+00> : vector<8x128xf32>
    %3 = tpu.matmul %0, %2, %cst {dimension_numbers = #tpu.dot_dimension_numbers<[1], [0], [0], [1], [0, 0, 1, 1], [], []>} : vector<8x128xbf16>, vector<128x128xbf16>, vector<8x128xf32> -> vector<8x128xf32>
    %c0_3 = arith.constant 0 : index
    %c0_4 = arith.constant 0 : index
    %4 = vector.load %arg5[%c0_3, %c0_4] : memref<1x128xf32, #tpu.memory_space<vmem>>, vector<1x128xf32>
    %5 = vector.broadcast %4 : vector<1x128xf32> to vector<8x128xf32>
    %6 = arith.addf %3, %5 : vector<8x128xf32>
    %cst_5 = arith.constant 0.000000e+00 : f32
    %7 = vector.broadcast %cst_5 : f32 to vector<8x128xf32>
    %8 = arith.maximumf %6, %7 : vector<8x128xf32>
    %9 = arith.truncf %8 : vector<8x128xf32> to vector<8x128xbf16>
    %c0_6 = arith.constant 0 : index
    %c0_7 = arith.constant 0 : index
    %10 = vector.load %arg3[%c0_6, %c0_7] : memref<128x128xbf16, #tpu.memory_space<vmem>>, vector<128x128xbf16>
    %cst_8 = arith.constant dense<0.000000e+00> : vector<8x128xf32>
    %11 = tpu.matmul %9, %10, %cst_8 {dimension_numbers = #tpu.dot_dimension_numbers<[1], [0], [0], [1], [0, 0, 1, 1], [], []>} : vector<8x128xbf16>, vector<128x128xbf16>, vector<8x128xf32> -> vector<8x128xf32>
    %c0_9 = arith.constant 0 : index
    %c0_10 = arith.constant 0 : index
    %12 = vector.load %arg6[%c0_9, %c0_10] : memref<1x128xf32, #tpu.memory_space<vmem>>, vector<1x128xf32>
    %13 = vector.broadcast %12 : vector<1x128xf32> to vector<8x128xf32>
    %14 = arith.addf %11, %13 : vector<8x128xf32>
    %cst_11 = arith.constant 0.000000e+00 : f32
    %15 = vector.broadcast %cst_11 : f32 to vector<8x128xf32>
    %16 = arith.maximumf %14, %15 : vector<8x128xf32>
    %17 = arith.truncf %16 : vector<8x128xf32> to vector<8x128xbf16>
    %c0_12 = arith.constant 0 : index
    %c0_13 = arith.constant 0 : index
    %18 = vector.load %arg4[%c0_12, %c0_13] : memref<128x128xbf16, #tpu.memory_space<vmem>>, vector<128x128xbf16>
    %cst_14 = arith.constant dense<0.000000e+00> : vector<8x128xf32>
    %19 = tpu.matmul %17, %18, %cst_14 {dimension_numbers = #tpu.dot_dimension_numbers<[1], [0], [0], [1], [0, 0, 1, 1], [], []>} : vector<8x128xbf16>, vector<128x128xbf16>, vector<8x128xf32> -> vector<8x128xf32>
    %c0_15 = arith.constant 0 : index
    %c0_16 = arith.constant 0 : index
    %20 = vector.load %arg7[%c0_15, %c0_16] : memref<1x128xf32, #tpu.memory_space<vmem>>, vector<1x128xf32>
    %21 = vector.broadcast %20 : vector<1x128xf32> to vector<8x128xf32>
    %22 = arith.addf %19, %21 : vector<8x128xf32>
    %23 = arith.truncf %22 : vector<8x128xf32> to vector<8x128xbf16>
    %c0_17 = arith.constant 0 : index
    %c0_18 = arith.constant 0 : index
    %24 = vector.load %arg8[%c0_17, %c0_18] : memref<8x128xbf16, #tpu.memory_space<vmem>>, vector<8x128xbf16>
    tpu.vector_store %arg8[%c0_17, %c0_18], %23 {strides = array<i32>} : memref<8x128xbf16, #tpu.memory_space<vmem>>, vector<8x128xbf16>,
    %25 = arith.subf %22, %1 : vector<8x128xf32>
    %26 = arith.mulf %25, %25 : vector<8x128xf32>
    %cst_19 = arith.constant dense<0.000000e+00> : vector<8xf32>
    %27 = vector.multi_reduction <add>, %26, %cst_19 [1] : vector<8x128xf32> to vector<8xf32>
    %cst_20 = arith.constant 3.125000e-02 : f32
    %28 = vector.broadcast %cst_20 : f32 to vector<8xf32>
    %29 = arith.mulf %27, %28 : vector<8xf32>
    %30 = vector.shape_cast %29 : vector<8xf32> to vector<1x1x8xf32>
    %31 = vector.broadcast %30 : vector<1x1x8xf32> to vector<1x8x8xf32>
    %c0_21 = arith.constant 0 : index
    %c0_22 = arith.constant 0 : index
    %c0_23 = arith.constant 0 : index
    %32 = vector.load %arg9[%c0_21, %c0_22, %c0_23] : memref<1x8x8xf32, #tpu.memory_space<vmem>>, vector<1x8x8xf32>
    tpu.vector_store %arg9[%c0_21, %c0_22, %c0_23], %31 {strides = array<i32>} : memref<1x8x8xf32, #tpu.memory_space<vmem>>, vector<1x8x8xf32>,
    return
  }
  func.func @transform_0(%arg0: i32) -> (i32, i32) {
    %c0_i32 = arith.constant 0 : i32
    %c0_i32_0 = arith.constant 0 : i32
    return %arg0, %c0_i32 : i32, i32
  }
  func.func @transform_1(%arg0: i32) -> (i32, i32) {
    %c0_i32 = arith.constant 0 : i32
    %c0_i32_0 = arith.constant 0 : i32
    %c0_i32_1 = arith.constant 0 : i32
    return %c0_i32, %c0_i32_0 : i32, i32
  }
  func.func @transform_2(%arg0: i32) -> (i32, i32) {
    %c0_i32 = arith.constant 0 : i32
    %c0_i32_0 = arith.constant 0 : i32
    %c0_i32_1 = arith.constant 0 : i32
    return %c0_i32, %c0_i32_0 : i32, i32
  }
  func.func @transform_3(%arg0: i32) -> (i32, i32) {
    %c0_i32 = arith.constant 0 : i32
    %c0_i32_0 = arith.constant 0 : i32
    %c0_i32_1 = arith.constant 0 : i32
    return %c0_i32, %c0_i32_0 : i32, i32
  }
  func.func @transform_4(%arg0: i32) -> (i32, i32) {
    %c0_i32 = arith.constant 0 : i32
    %c0_i32_0 = arith.constant 0 : i32
    %c0_i32_1 = arith.constant 0 : i32
    return %c0_i32, %c0_i32_0 : i32, i32
  }
  func.func @transform_5(%arg0: i32) -> (i32, i32) {
    %c0_i32 = arith.constant 0 : i32
    %c0_i32_0 = arith.constant 0 : i32
    %c0_i32_1 = arith.constant 0 : i32
    return %c0_i32, %c0_i32_0 : i32, i32
  }
  func.func @transform_6(%arg0: i32) -> (i32, i32) {
    %c0_i32 = arith.constant 0 : i32
    %c0_i32_0 = arith.constant 0 : i32
    %c0_i32_1 = arith.constant 0 : i32
    return %c0_i32, %c0_i32_0 : i32, i32
  }
  func.func @transform_7(%arg0: i32) -> (i32, i32) {
    %c0_i32 = arith.constant 0 : i32
    %c0_i32_0 = arith.constant 0 : i32
    return %arg0, %c0_i32 : i32, i32
  }
  func.func @transform_8(%arg0: i32) -> (i32, i32, i32) {
    %c0_i32 = arith.constant 0 : i32
    %c0_i32_0 = arith.constant 0 : i32
    %c0_i32_1 = arith.constant 0 : i32
    return %arg0, %c0_i32, %c0_i32_0 : i32, i32, i32
  }
}

module attributes {stable_mosaic.version = 11 : i64} {
  func.func @_ood_kernel(%arg0: i32, %arg1: memref<8x128xbf16, #tpu.memory_space<vmem>>, %arg2: memref<128x128xbf16, #tpu.memory_space<vmem>>, %arg3: memref<128x128xbf16, #tpu.memory_space<vmem>>, %arg4: memref<128x128xbf16, #tpu.memory_space<vmem>>, %arg5: memref<1x128xf32, #tpu.memory_space<vmem>>, %arg6: memref<1x128xf32, #tpu.memory_space<vmem>>, %arg7: memref<1x128xf32, #tpu.memory_space<vmem>>, %arg8: memref<8x128xbf16, #tpu.memory_space<vmem>>, %arg9: memref<8x1xf32, #tpu.memory_space<vmem>>) attributes {dimension_semantics = [#tpu.dimension_semantics<parallel>], iteration_bounds = array<i64: 1>, scalar_prefetch = 0 : i64, scratch_operands = 0 : i64, tpu.core_type = #tpu.core_type<tc>, window_params = [{transform_indices = @transform_0, window_bounds = array<i64: 8, 128>}, {pipeline_mode = #tpu.pipeline_mode<synchronous>, transform_indices = @transform_1, window_bounds = array<i64: 128, 128>}, {pipeline_mode = #tpu.pipeline_mode<synchronous>, transform_indices = @transform_2, window_bounds = array<i64: 128, 128>}, {pipeline_mode = #tpu.pipeline_mode<synchronous>, transform_indices = @transform_3, window_bounds = array<i64: 128, 128>}, {pipeline_mode = #tpu.pipeline_mode<synchronous>, transform_indices = @transform_4, window_bounds = array<i64: 1, 128>}, {pipeline_mode = #tpu.pipeline_mode<synchronous>, transform_indices = @transform_5, window_bounds = array<i64: 1, 128>}, {pipeline_mode = #tpu.pipeline_mode<synchronous>, transform_indices = @transform_6, window_bounds = array<i64: 1, 128>}, {transform_indices = @transform_7, window_bounds = array<i64: 8, 128>}, {transform_indices = @transform_8, window_bounds = array<i64: 8, 1>}]} {
    %c0 = arith.constant 0 : index
    %c0_0 = arith.constant 0 : index
    %0 = vector.load %arg1[%c0, %c0_0] : memref<8x128xbf16, #tpu.memory_space<vmem>>, vector<8x128xbf16>
    %1 = arith.extf %0 : vector<8x128xbf16> to vector<8x128xf32>
    %c0_1 = arith.constant 0 : index
    %c0_2 = arith.constant 0 : index
    %2 = vector.load %arg2[%c0_1, %c0_2] : memref<128x128xbf16, #tpu.memory_space<vmem>>, vector<128x128xbf16>
    %cst = arith.constant dense<0.000000e+00> : vector<8x128xf32>
    %3 = tpu.matmul %0, %2, %cst {dimension_numbers = #tpu.dot_dimension_numbers<[1], [0], [0], [1], [0, 0, 1, 1], [], []>} : vector<8x128xbf16>, vector<128x128xbf16>, vector<8x128xf32> -> vector<8x128xf32>
    %c0_3 = arith.constant 0 : index
    %c0_4 = arith.constant 0 : index
    %4 = vector.load %arg5[%c0_3, %c0_4] : memref<1x128xf32, #tpu.memory_space<vmem>>, vector<1x128xf32>
    %5 = vector.broadcast %4 : vector<1x128xf32> to vector<8x128xf32>
    %6 = arith.addf %3, %5 : vector<8x128xf32>
    %cst_5 = arith.constant 0.000000e+00 : f32
    %7 = vector.broadcast %cst_5 : f32 to vector<8x128xf32>
    %8 = arith.maximumf %6, %7 : vector<8x128xf32>
    %9 = arith.truncf %8 : vector<8x128xf32> to vector<8x128xbf16>
    %c0_6 = arith.constant 0 : index
    %c0_7 = arith.constant 0 : index
    %10 = vector.load %arg3[%c0_6, %c0_7] : memref<128x128xbf16, #tpu.memory_space<vmem>>, vector<128x128xbf16>
    %cst_8 = arith.constant dense<0.000000e+00> : vector<8x128xf32>
    %11 = tpu.matmul %9, %10, %cst_8 {dimension_numbers = #tpu.dot_dimension_numbers<[1], [0], [0], [1], [0, 0, 1, 1], [], []>} : vector<8x128xbf16>, vector<128x128xbf16>, vector<8x128xf32> -> vector<8x128xf32>
    %c0_9 = arith.constant 0 : index
    %c0_10 = arith.constant 0 : index
    %12 = vector.load %arg6[%c0_9, %c0_10] : memref<1x128xf32, #tpu.memory_space<vmem>>, vector<1x128xf32>
    %13 = vector.broadcast %12 : vector<1x128xf32> to vector<8x128xf32>
    %14 = arith.addf %11, %13 : vector<8x128xf32>
    %cst_11 = arith.constant 0.000000e+00 : f32
    %15 = vector.broadcast %cst_11 : f32 to vector<8x128xf32>
    %16 = arith.maximumf %14, %15 : vector<8x128xf32>
    %17 = arith.truncf %16 : vector<8x128xf32> to vector<8x128xbf16>
    %c0_12 = arith.constant 0 : index
    %c0_13 = arith.constant 0 : index
    %18 = vector.load %arg4[%c0_12, %c0_13] : memref<128x128xbf16, #tpu.memory_space<vmem>>, vector<128x128xbf16>
    %cst_14 = arith.constant dense<0.000000e+00> : vector<8x128xf32>
    %19 = tpu.matmul %17, %18, %cst_14 {dimension_numbers = #tpu.dot_dimension_numbers<[1], [0], [0], [1], [0, 0, 1, 1], [], []>} : vector<8x128xbf16>, vector<128x128xbf16>, vector<8x128xf32> -> vector<8x128xf32>
    %c0_15 = arith.constant 0 : index
    %c0_16 = arith.constant 0 : index
    %20 = vector.load %arg7[%c0_15, %c0_16] : memref<1x128xf32, #tpu.memory_space<vmem>>, vector<1x128xf32>
    %21 = vector.broadcast %20 : vector<1x128xf32> to vector<8x128xf32>
    %22 = arith.addf %19, %21 : vector<8x128xf32>
    %23 = arith.truncf %22 : vector<8x128xf32> to vector<8x128xbf16>
    %c0_17 = arith.constant 0 : index
    %c0_18 = arith.constant 0 : index
    %24 = vector.load %arg8[%c0_17, %c0_18] : memref<8x128xbf16, #tpu.memory_space<vmem>>, vector<8x128xbf16>
    tpu.vector_store %arg8[%c0_17, %c0_18], %23 {strides = array<i32>} : memref<8x128xbf16, #tpu.memory_space<vmem>>, vector<8x128xbf16>,
    %25 = arith.subf %22, %1 : vector<8x128xf32>
    %26 = arith.mulf %25, %25 : vector<8x128xf32>
    %cst_19 = arith.constant dense<0.000000e+00> : vector<8xf32>
    %27 = vector.multi_reduction <add>, %26, %cst_19 [1] : vector<8x128xf32> to vector<8xf32>
    %28 = vector.shape_cast %27 : vector<8xf32> to vector<8x1xf32>
    %cst_20 = arith.constant 3.125000e-02 : f32
    %29 = vector.broadcast %cst_20 : f32 to vector<8x1xf32>
    %30 = arith.mulf %28, %29 : vector<8x1xf32>
    %c0_21 = arith.constant 0 : index
    %c0_22 = arith.constant 0 : index
    %31 = vector.load %arg9[%c0_21, %c0_22] : memref<8x1xf32, #tpu.memory_space<vmem>>, vector<8x1xf32>
    tpu.vector_store %arg9[%c0_21, %c0_22], %30 {strides = array<i32>} : memref<8x1xf32, #tpu.memory_space<vmem>>, vector<8x1xf32>,
    return
  }
  func.func @transform_0(%arg0: i32) -> (i32, i32) {
    %c0_i32 = arith.constant 0 : i32
    %c0_i32_0 = arith.constant 0 : i32
    return %arg0, %c0_i32 : i32, i32
  }
  func.func @transform_1(%arg0: i32) -> (i32, i32) {
    %c0_i32 = arith.constant 0 : i32
    %c0_i32_0 = arith.constant 0 : i32
    %c0_i32_1 = arith.constant 0 : i32
    return %c0_i32, %c0_i32_0 : i32, i32
  }
  func.func @transform_2(%arg0: i32) -> (i32, i32) {
    %c0_i32 = arith.constant 0 : i32
    %c0_i32_0 = arith.constant 0 : i32
    %c0_i32_1 = arith.constant 0 : i32
    return %c0_i32, %c0_i32_0 : i32, i32
  }
  func.func @transform_3(%arg0: i32) -> (i32, i32) {
    %c0_i32 = arith.constant 0 : i32
    %c0_i32_0 = arith.constant 0 : i32
    %c0_i32_1 = arith.constant 0 : i32
    return %c0_i32, %c0_i32_0 : i32, i32
  }
  func.func @transform_4(%arg0: i32) -> (i32, i32) {
    %c0_i32 = arith.constant 0 : i32
    %c0_i32_0 = arith.constant 0 : i32
    %c0_i32_1 = arith.constant 0 : i32
    return %c0_i32, %c0_i32_0 : i32, i32
  }
  func.func @transform_5(%arg0: i32) -> (i32, i32) {
    %c0_i32 = arith.constant 0 : i32
    %c0_i32_0 = arith.constant 0 : i32
    %c0_i32_1 = arith.constant 0 : i32
    return %c0_i32, %c0_i32_0 : i32, i32
  }
  func.func @transform_6(%arg0: i32) -> (i32, i32) {
    %c0_i32 = arith.constant 0 : i32
    %c0_i32_0 = arith.constant 0 : i32
    %c0_i32_1 = arith.constant 0 : i32
    return %c0_i32, %c0_i32_0 : i32, i32
  }
  func.func @transform_7(%arg0: i32) -> (i32, i32) {
    %c0_i32 = arith.constant 0 : i32
    %c0_i32_0 = arith.constant 0 : i32
    return %arg0, %c0_i32 : i32, i32
  }
  func.func @transform_8(%arg0: i32) -> (i32, i32) {
    %c0_i32 = arith.constant 0 : i32
    %c0_i32_0 = arith.constant 0 : i32
    return %arg0, %c0_i32 : i32, i32
  }
}

</mosaic_0001>

<bundles_post_ra>
// kernel: tpu_custom_call.1
= control target key start
LH: loop header
LB: loop body
LE: loop exit
PB: predicated region body
PF: predicated region fallthrough
CT: control target
= control target key end

     0   :  { %14 = vsyncpa [#allocation3], 0  ;;  %s882_s0 = inlined_call_operand.hbm [shape: bf16[8,128], index: 0, kind: input, shape index: {}]   ;;  %s883_s1 = inlined_call_operand.hbm [shape: bf16[128,128], index: 1, kind: input, shape index: {}]   ;;  %s884_s2 = inlined_call_operand.hbm [shape: bf16[128,128], index: 2, kind: input, shape index: {}]   ;;  %s885_s3 = inlined_call_operand.hbm [shape: bf16[128,128], index: 3, kind: input, shape index: {}]   ;;  %s886_s4 = inlined_call_operand.vmem [shape: f32[1,128], index: 4, kind: input, shape index: {}]   ;;  %s887_s5 = inlined_call_operand.vmem [shape: f32[1,128], index: 5, kind: input, shape index: {}]   ;;  %s888_s6 = inlined_call_operand.vmem [shape: f32[1,128], index: 6, kind: input, shape index: {}]   ;;  %s889_s7 = inlined_call_operand.hbm [shape: bf16[8,128], index: 7, kind: output, shape index: {0}]   ;;  %s890_s8 = inlined_call_operand.hbm [shape: f32[1,8,8], index: 8, kind: output, shape index: {1}]  }
   0x1   :  { %15 = vsyncpa [#allocation6], 0 }
   0x2   :  { %16 = vsyncpa [#allocation9], 0 }
   0x3   :  { %17 = vsyncpa [#allocation4], 0 }
   0x4   :  { %18 = vsyncpa [#allocation12], 0  ;;  %s761_s27 = smov [#allocation5]  }
   0x5   :  { %s34_s28 = sshll.u32 %s761_s27, 4  ;;  %s35_s28 = int_to_ptr.vmem [resolvable:$true] %s34_s28 }
   0x6   :  { %s639_s29 = scalar_lea.vmem %s35_s28, 1024  ;;  %p644_p1 = scmp.lt.s32.totalorder %s35_s28, %s35_s28 }
   0x7   :  { %p640_p0 = scmp.ne.s32.totalorder %s35_s28, %s639_s29  ;;  %p645_p2 = scmp.lt.s32.totalorder %s639_s29, %s639_s29 }
   0x9   :  { %p646_p3 = por %p645_p2, %p644_p1 }
   0xb   :  { %p647_p4 = pnand %p646_p3, %p640_p0 }
   0xd   :  { %650 = shalt.err (!%p647_p4)
}
   0xe   :  { %s762_s30 = smov 64   ;;  %s763_s9 = smov 4  }
   0xf   :  { %40 = dma.hbm_to_vmem [thread:$0]  %s883_s1, 1024, %s35_s28, [#allocation6], %s762_s30, %s762_s30, %s763_s9  }
  0x10   :  { %s764_s12 = smov [#allocation2]   ;;  %s765_s14 = smov [#allocation7]  }
  0x11   :  { %s25_s13 = sshll.u32 %s764_s12, 4  ;;  %s46_s15 = sshll.u32 %s765_s14, 4  ;;  %s26_s13 = int_to_ptr.vmem [resolvable:$true] %s25_s13  ;;  %s47_s15 = int_to_ptr.vmem [resolvable:$true] %s46_s15 }
  0x12   :  { %s659_s16 = scalar_lea.vmem %s26_s13, 64  ;;  %p664_p6 = scmp.lt.s32.totalorder %s26_s13, %s26_s13 }
  0x13   :  { %p660_p5 = scmp.ne.s32.totalorder %s26_s13, %s659_s16  ;;  %p665_p7 = scmp.lt.s32.totalorder %s659_s16, %s659_s16 }
  0x15   :  { %p666_p8 = por %p665_p7, %p664_p6 }
  0x17   :  { %p667_p9 = pnand %p666_p8, %p660_p5 }
  0x19   :  { %670 = shalt.err (!%p667_p9)
}
  0x1a   :  { %28 = dma.hbm_to_vmem [thread:$0]  %s882_s0, 64, %s26_s13, [#allocation3]  }
  0x1b   :  { %s679_s19 = scalar_lea.vmem %s47_s15, 1024  ;;  %p684_p11 = scmp.lt.s32.totalorder %s47_s15, %s47_s15 }
  0x1c   :  { %p680_p10 = scmp.ne.s32.totalorder %s47_s15, %s679_s19  ;;  %p685_p12 = scmp.lt.s32.totalorder %s679_s19, %s679_s19 }
  0x1e   :  { %p686_p13 = por %p685_p12, %p684_p11 }
  0x20   :  { %p687_p0 = pnand %p686_p13, %p680_p10 }
  0x22   :  { %690 = shalt.err (!%p687_p0)
}
  0x23   :  { %52 = dma.hbm_to_vmem [thread:$0]  %s884_s2, 1024, %s47_s15, [#allocation6], %s762_s30, %s762_s30, %s763_s9  }
  0x24   :  { %s766_s21 = smov [#allocation8]  }
  0x25   :  { %s58_s22 = sshll.u32 %s766_s21, 4  ;;  %s59_s22 = int_to_ptr.vmem [resolvable:$true] %s58_s22 }
  0x26   :  { %s699_s23 = scalar_lea.vmem %s59_s22, 1024  ;;  %p704_p2 = scmp.lt.s32.totalorder %s59_s22, %s59_s22 }
  0x27   :  { %p700_p1 = scmp.ne.s32.totalorder %s59_s22, %s699_s23  ;;  %p705_p3 = scmp.lt.s32.totalorder %s699_s23, %s699_s23 }
  0x29   :  { %p706_p4 = por %p705_p3, %p704_p2 }
  0x2b   :  { %p707_p5 = pnand %p706_p4, %p700_p1 }
  0x2d   :  { %710 = shalt.err (!%p707_p5)
}
  0x2e   :  { %64 = dma.hbm_to_vmem [thread:$0]  %s885_s3, 1024, %s59_s22, [#allocation9], %s762_s30, %s762_s30, %s763_s9  }
  0x2f   :  { %751 = dma.done.wait [#allocation3], 64  }
  0x30   :  { %752 = vsyncadd [#allocation3], 4294967232 }
  0x31   :  { %753 = dma.done.wait [#allocation6], 2048  }
  0x32   :  { %754 = vsyncadd [#allocation6], 4294965248 }
  0x33   :  { %755 = dma.done.wait [#allocation9], 1024  }
  0x34   :  { %756 = vsyncadd [#allocation9], 4294966272  ;;  %v767_v0 = vmov 0.0   ;;  %vm768_vm0 = vmmov 0   ;;  %v607_v1 = vld [vmem:[#allocation5 + $0x38] sm:$0xff]   ;;  %v608_v2 = vld [vmem:[#allocation5 + $0x30] sm:$0xff]  }
  0x35   :  { %537 = vmatprep.subr.bf16.mxu0 %v767_v0  ;;  %553 = vmatprep.mubr.msk.bf16.mxu0 %vm768_vm0, %v767_v0  ;;  %v609_v3 = vld [vmem:[#allocation5 + $0x28] sm:$0xff]   ;;  %v615_v4 = vld [vmem:[#allocation7 + $0x38] sm:$0xff]   ;;  %v610_v5 = vld [vmem:[#allocation5 + $0x20] sm:$0xff]  }
  0x36   :  { %557 = vmatprep.subr.bf16.mxu1 %v767_v0  ;;  %573 = vmatprep.mubr.msk.bf16.mxu1 %vm768_vm0, %v767_v0  ;;  %v616_v6 = vld [vmem:[#allocation7 + $0x30] sm:$0xff]   ;;  %v611_v7 = vld [vmem:[#allocation5 + $0x18] sm:$0xff]   ;;  %v617_v8 = vld [vmem:[#allocation7 + $0x28] sm:$0xff]  }
  0x37   :  { %538 = vmatpush3.bf16.msra.mxu0 %v607_v1  ;;  %558 = vmatpush3.bf16.msra.mxu1 %v615_v4  ;;  %v612_v9 = vld [vmem:[#allocation5 + $0x10] sm:$0xff]   ;;  %v618_v10 = vld [vmem:[#allocation7 + $0x20] sm:$0xff]   ;;  %v613_v11 = vld [vmem:[#allocation5 + $0x8] sm:$0xff]  }
  0x38   :  { %539 = vmatprep.subr.bf16.mxu0 %v767_v0  ;;  %559 = vmatprep.subr.bf16.mxu1 %v767_v0  ;;  %v619_v12 = vld [vmem:[#allocation7 + $0x18] sm:$0xff]   ;;  %v614_v13 = vld [vmem:[#allocation5] sm:$0xff]   ;;  %v620_v14 = vld [vmem:[#allocation7 + $0x10] sm:$0xff]  }
  0x39   :  { %v84_v15 = vld [vmem:[#allocation2] sm:$0xf]  ;;  %v621_v16 = vld [vmem:[#allocation7 + $0x8] sm:$0xff]   ;;  %v622_v17 = vld [vmem:[#allocation7] sm:$0xff]  }
  0x3a   :  { %v623_v18 = vld [vmem:[#allocation8 + $0x38] sm:$0xff]   ;;  %v624_v19 = vld [vmem:[#allocation8 + $0x30] sm:$0xff]   ;;  %v625_v20 = vld [vmem:[#allocation8 + $0x28] sm:$0xff]   ;;  %v85_v43 = vunpack.c.l.bf16 %v84_v15 }
  0x3b   :  { %540 = vmatpush3.bf16.msra.mxu0 %v608_v2  ;;  %560 = vmatpush3.bf16.msra.mxu1 %v616_v6  ;;  %v626_v21 = vld [vmem:[#allocation8 + $0x20] sm:$0xff]   ;;  %v627_v22 = vld [vmem:[#allocation8 + $0x18] sm:$0xff]   ;;  %v628_v23 = vld [vmem:[#allocation8 + $0x10] sm:$0xff]  }
  0x3c   :  { %541 = vmatprep.subr.bf16.mxu0 %v767_v0  ;;  %561 = vmatprep.subr.bf16.mxu1 %v767_v0  ;;  %v483_v24 = vld [vmem:[%s886_s4] ss:$0 sm:$0xff]  ;;  %v629_v32 = vld [vmem:[#allocation8 + $0x8] sm:$0xff]   ;;  %v630_v33 = vld [vmem:[#allocation8] sm:$0xff]  }
  0x3d   :  { %v492_v34 = vld [vmem:[%s887_s5] ss:$0 sm:$0xff]  ;;  %s769_s5 = smov [#allocation10]  }
  0x3e   :  { %v501_v42 = vld [vmem:[%s888_s6] ss:$0 sm:$0xff]  ;;  %s458_s28 = sshll.u32 %s769_s5, 4  ;;  %s459_s28 = int_to_ptr.vmem [resolvable:$true] %s458_s28 }
  0x3f   :  { %542 = vmatpush3.bf16.msra.mxu0 %v609_v3  ;;  %562 = vmatpush3.bf16.msra.mxu1 %v617_v8  ;;  %s711_s29 = scalar_lea.vmem %s459_s28, 64  ;;  %p716_p7 = scmp.lt.s32.totalorder %s459_s28, %s459_s28 }
  0x40   :  { %543 = vmatprep.subr.bf16.mxu0 %v767_v0  ;;  %563 = vmatprep.subr.bf16.mxu1 %v767_v0  ;;  %p712_p6 = scmp.ne.s32.totalorder %s459_s28, %s711_s29  ;;  %p717_p8 = scmp.lt.s32.totalorder %s711_s29, %s711_s29 }
  0x42   :  { %p718_p9 = por %p717_p8, %p716_p7 }
  0x43   :  { %544 = vmatpush3.bf16.msra.mxu0 %v610_v5  ;;  %564 = vmatpush3.bf16.msra.mxu1 %v618_v10 }
  0x44   :  { %545 = vmatprep.subr.bf16.mxu0 %v767_v0  ;;  %565 = vmatprep.subr.bf16.mxu1 %v767_v0  ;;  %p719_p10 = pnand %p718_p9, %p712_p6 }
  0x47   :  { %546 = vmatpush3.bf16.msra.mxu0 %v611_v7  ;;  %566 = vmatpush3.bf16.msra.mxu1 %v619_v12 }
  0x48   :  { %547 = vmatprep.subr.bf16.mxu0 %v767_v0  ;;  %567 = vmatprep.subr.bf16.mxu1 %v767_v0 }
  0x4b   :  { %548 = vmatpush3.bf16.msra.mxu0 %v612_v9  ;;  %568 = vmatpush3.bf16.msra.mxu1 %v620_v14 }
  0x4c   :  { %549 = vmatprep.subr.bf16.mxu0 %v767_v0  ;;  %569 = vmatprep.subr.bf16.mxu1 %v767_v0 }
  0x4f   :  { %550 = vmatpush3.bf16.msra.mxu0 %v613_v11  ;;  %570 = vmatpush3.bf16.msra.mxu1 %v621_v16 }
  0x50   :  { %551 = vmatprep.subr.bf16.mxu0 %v767_v0  ;;  %571 = vmatprep.subr.bf16.mxu1 %v767_v0 }
  0x53   :  { %552 = vmatpush3.bf16.msra.mxu0 %v614_v13  ;;  %572 = vmatpush3.bf16.msra.mxu1 %v622_v17 }
  0x54   :  { %577 = vmatprep.subr.bf16.mxu0 %v767_v0 }
  0x56   :  { %554 = vmatmul.mubr.bf16.vlgmr.msra.gmra.mxu0 %v84_v15 }
  0x57   :  { %593 = vmatprep.mubr.msk.bf16.mxu0 %vm768_vm0, %v767_v0  ;;  %578 = vmatpush3.bf16.msra.mxu0 %v623_v18 }
  0x58   :  { %579 = vmatprep.subr.bf16.mxu0 %v767_v0 }
  0x5b   :  { %580 = vmatpush3.bf16.msra.mxu0 %v624_v19 }
  0x5c   :  { %581 = vmatprep.subr.bf16.mxu0 %v767_v0 }
  0x5f   :  { %582 = vmatpush3.bf16.msra.mxu0 %v625_v20 }
  0x60   :  { %583 = vmatprep.subr.bf16.mxu0 %v767_v0 }
  0x63   :  { %584 = vmatpush3.bf16.msra.mxu0 %v626_v21 }
  0x64   :  { %585 = vmatprep.subr.bf16.mxu0 %v767_v0 }
  0x67   :  { %586 = vmatpush3.bf16.msra.mxu0 %v627_v22 }
  0x68   :  { %587 = vmatprep.subr.bf16.mxu0 %v767_v0 }
  0x6b   :  { %588 = vmatpush3.bf16.msra.mxu0 %v628_v23 }
  0x6c   :  { %589 = vmatprep.subr.bf16.mxu0 %v767_v0 }
  0x6f   :  { %590 = vmatpush3.bf16.msra.mxu0 %v629_v32 }
  0x70   :  { %591 = vmatprep.subr.bf16.mxu0 %v767_v0 }
  0x73   :  { %592 = vmatpush3.bf16.msra.mxu0 %v630_v33 }
 0x116   :  { %v191_v25 = vpop.f32.mrf.mxu0 }
 0x117   :  { %v192_v26 = vadd.f32 %v483_v24, %v191_v25 }
 0x118   :  { %v555_v27 = vpop.f32.mrf.mxu0 }
 0x119   :  { %v197_v28 = vmax.f32 %v192_v26, 0.0 }
 0x11a   :  { %v194_v29 = vpop.f32.mrf.mxu0 }
 0x11b   :  { %v198_v30 = vpack.c.bf16 %v197_v28, %v197_v28 }
 0x11c   :  { %v556_v31 = vpop.f32.mrf.mxu0 }
 0x11d   :  { %574 = vmatmul.mubr.bf16.vlgmr.msra.gmra.mxu1 %v198_v30 }
 0x1dd   :  { %v304_v35 = vpop.f32.mrf.mxu1 }
 0x1de   :  { %v305_v36 = vadd.f32 %v492_v34, %v304_v35 }
 0x1df   :  { %v575_v37 = vpop.f32.mrf.mxu1 }
 0x1e0   :  { %v310_v38 = vmax.f32 %v305_v36, 0.0 }
 0x1e1   :  { %v307_v39 = vpop.f32.mrf.mxu1 }
 0x1e2   :  { %v311_v40 = vpack.c.bf16 %v310_v38, %v310_v38 }
 0x1e3   :  { %v576_v41 = vpop.f32.mrf.mxu1 }
 0x1e4   :  { %594 = vmatmul.mubr.bf16.vlgmr.msra.gmra.mxu0 %v311_v40 }
 0x2a4   :  { %v417_v44 = vpop.f32.mrf.mxu0 }
 0x2a5   :  { %v418_v45 = vadd.f32 %v501_v42, %v417_v44 }
 0x2a6   :  { %v595_v46 = vpop.f32.mrf.mxu0 }
 0x2a7   :  { %v423_v47 = vpack.c.bf16 %v418_v45, %v418_v45  ;;  %v425_v48 = vsub.f32 %v418_v45, %v85_v43 }
 0x2a8   :  { %v420_v49 = vpop.f32.mrf.mxu0 }
 0x2a9   :  { %424 = vst [vmem:[#allocation10] sm:$0xf] %v423_v47  ;;  %v426_v50 = vmul.f32 %v425_v48, %v425_v48 }
 0x2aa   :  { %v596_v51 = vpop.f32.mrf.mxu0 }
 0x2ab   :  { %427 = vadd.xlane.f32.xlu0 %v426_v50 }
 0x2ac   :  { %722 = shalt.err (!%p719_p10)
}
 0x2ad   :  { %461 = dma.vmem_to_hbm [thread:$0]  %s459_s28, 64, %s889_s7, [#allocation4]   ;;  %v431_v52 = vlaneseq  ;;  %vm450_vm1 = vcmask 64512  }
 0x2ae   :  { %s770_s9 = smov [#allocation11]  }
 0x2af   :  { %v432_v53 = vand.u32 127, %v431_v52  ;;  %v434_v54 = vshrl.u32 %v431_v52, 7  ;;  %s468_s10 = sshll.u32 %s770_s9, 4  ;;  %s469_s10 = int_to_ptr.vmem [resolvable:$true] %s468_s10 }
 0x2b0   :  { %s731_s11 = scalar_lea.vmem %s469_s10, 128  ;;  %p736_p12 = scmp.lt.s32.totalorder %s469_s10, %s469_s10 }
 0x2b1   :  { %v435_v55 = vsub.s32 %v432_v53, %v434_v54  ;;  %p732_p11 = scmp.ne.s32.totalorder %s469_s10, %s731_s11  ;;  %p737_p13 = scmp.lt.s32.totalorder %s731_s11, %s731_s11 }
 0x2b3   :  { %p738_p0 = por %p737_p13, %p736_p12 }
 0x2b5   :  { %p739_p1 = pnand %p738_p0, %p732_p11 }
 0x334   :  { %v428_v56 = vpop.xlane.xlu0 %427 }
 0x335   :  { %v429_v57 = vmul.f32 0.03125, %v428_v56 }
 0x337   :  { %v436_v58 = vrot.slane %v429_v57, %v435_v55 }
 0x339   :  { %451 = vst.msk [vmem:[#allocation11] sm:$0xff] %vm450_vm1, %v436_v58 }
 0x33a   :  { %742 = shalt.err (!%p739_p1)
}
 0x33b   :  { %471 = dma.vmem_to_hbm [thread:$0]  %s469_s10, 128, %s890_s8, [#allocation12]  }
 0x33c   :  { %757 = dma.done.wait [#allocation4], 64  }
 0x33d   :  { %758 = vsyncadd [#allocation4], 4294967232 }
 0x33e   :  { %759 = dma.done.wait [#allocation12], 128  }
 0x33f   :  { %760 = vsyncadd [#allocation12], 4294967168 }
 0x340   :  { %478 = vsyncpa [#allocation3], 1 }
 0x341   :  { %479 = vsyncpa [#allocation6], 1 }
 0x342   :  { %480 = vsyncpa [#allocation9], 1 }
 0x343   :  { %481 = vsyncpa [#allocation4], 1 }
 0x344   :  { %482 = vsyncpa [#allocation12], 1 }

// kernel: tpu_custom_call.1
= control target key start
LH: loop header
LB: loop body
LE: loop exit
PB: predicated region body
PF: predicated region fallthrough
CT: control target
= control target key end

     0   :  { %14 = vsyncpa [#allocation3], 0  ;;  %s827_s0 = inlined_call_operand.hbm [shape: bf16[8,128], index: 0, kind: input, shape index: {}]   ;;  %s828_s1 = inlined_call_operand.hbm [shape: bf16[128,128], index: 1, kind: input, shape index: {}]   ;;  %s829_s2 = inlined_call_operand.hbm [shape: bf16[128,128], index: 2, kind: input, shape index: {}]   ;;  %s830_s3 = inlined_call_operand.hbm [shape: bf16[128,128], index: 3, kind: input, shape index: {}]   ;;  %s831_s4 = inlined_call_operand.vmem [shape: f32[1,128], index: 4, kind: input, shape index: {}]   ;;  %s832_s5 = inlined_call_operand.vmem [shape: f32[1,128], index: 5, kind: input, shape index: {}]   ;;  %s833_s6 = inlined_call_operand.vmem [shape: f32[1,128], index: 6, kind: input, shape index: {}]   ;;  %s834_s7 = inlined_call_operand.hbm [shape: bf16[8,128], index: 7, kind: output, shape index: {0}]   ;;  %s835_s8 = inlined_call_operand.vmem [shape: f32[8,1], index: 8, kind: output, shape index: {1}]  }
   0x1   :  { %15 = vsyncpa [#allocation6], 0 }
   0x2   :  { %16 = vsyncpa [#allocation9], 0 }
   0x3   :  { %17 = vsyncpa [#allocation4], 0  ;;  %s707_s27 = smov [#allocation5]  }
   0x4   :  { %s33_s28 = sshll.u32 %s707_s27, 4  ;;  %s34_s28 = int_to_ptr.vmem [resolvable:$true] %s33_s28 }
   0x5   :  { %s607_s29 = scalar_lea.vmem %s34_s28, 1024  ;;  %p612_p1 = scmp.lt.s32.totalorder %s34_s28, %s34_s28 }
   0x6   :  { %p608_p0 = scmp.ne.s32.totalorder %s34_s28, %s607_s29  ;;  %p613_p2 = scmp.lt.s32.totalorder %s607_s29, %s607_s29 }
   0x8   :  { %p614_p3 = por %p613_p2, %p612_p1 }
   0xa   :  { %p615_p4 = pnand %p614_p3, %p608_p0 }
   0xc   :  { %618 = shalt.err (!%p615_p4)
}
   0xd   :  { %s708_s30 = smov 64   ;;  %s709_s9 = smov 4  }
   0xe   :  { %39 = dma.hbm_to_vmem [thread:$0]  %s828_s1, 1024, %s34_s28, [#allocation6], %s708_s30, %s708_s30, %s709_s9  }
   0xf   :  { %s710_s12 = smov [#allocation2]   ;;  %s711_s14 = smov [#allocation7]  }
  0x10   :  { %s24_s13 = sshll.u32 %s710_s12, 4  ;;  %s45_s15 = sshll.u32 %s711_s14, 4  ;;  %s25_s13 = int_to_ptr.vmem [resolvable:$true] %s24_s13  ;;  %s46_s15 = int_to_ptr.vmem [resolvable:$true] %s45_s15 }
  0x11   :  { %s627_s16 = scalar_lea.vmem %s25_s13, 64  ;;  %p632_p6 = scmp.lt.s32.totalorder %s25_s13, %s25_s13 }
  0x12   :  { %p628_p5 = scmp.ne.s32.totalorder %s25_s13, %s627_s16  ;;  %p633_p7 = scmp.lt.s32.totalorder %s627_s16, %s627_s16 }
  0x14   :  { %p634_p8 = por %p633_p7, %p632_p6 }
  0x16   :  { %p635_p9 = pnand %p634_p8, %p628_p5 }
  0x18   :  { %638 = shalt.err (!%p635_p9)
}
  0x19   :  { %27 = dma.hbm_to_vmem [thread:$0]  %s827_s0, 64, %s25_s13, [#allocation3]  }
  0x1a   :  { %s647_s19 = scalar_lea.vmem %s46_s15, 1024  ;;  %p652_p11 = scmp.lt.s32.totalorder %s46_s15, %s46_s15 }
  0x1b   :  { %p648_p10 = scmp.ne.s32.totalorder %s46_s15, %s647_s19  ;;  %p653_p12 = scmp.lt.s32.totalorder %s647_s19, %s647_s19 }
  0x1d   :  { %p654_p13 = por %p653_p12, %p652_p11 }
  0x1f   :  { %p655_p0 = pnand %p654_p13, %p648_p10 }
  0x21   :  { %658 = shalt.err (!%p655_p0)
}
  0x22   :  { %51 = dma.hbm_to_vmem [thread:$0]  %s829_s2, 1024, %s46_s15, [#allocation6], %s708_s30, %s708_s30, %s709_s9  }
  0x23   :  { %s712_s21 = smov [#allocation8]  }
  0x24   :  { %s57_s22 = sshll.u32 %s712_s21, 4  ;;  %s58_s22 = int_to_ptr.vmem [resolvable:$true] %s57_s22 }
  0x25   :  { %s667_s23 = scalar_lea.vmem %s58_s22, 1024  ;;  %p672_p2 = scmp.lt.s32.totalorder %s58_s22, %s58_s22 }
  0x26   :  { %p668_p1 = scmp.ne.s32.totalorder %s58_s22, %s667_s23  ;;  %p673_p3 = scmp.lt.s32.totalorder %s667_s23, %s667_s23 }
  0x28   :  { %p674_p4 = por %p673_p3, %p672_p2 }
  0x2a   :  { %p675_p5 = pnand %p674_p4, %p668_p1 }
  0x2c   :  { %678 = shalt.err (!%p675_p5)
}
  0x2d   :  { %63 = dma.hbm_to_vmem [thread:$0]  %s830_s3, 1024, %s58_s22, [#allocation9], %s708_s30, %s708_s30, %s709_s9  }
  0x2e   :  { %699 = dma.done.wait [#allocation3], 64  }
  0x2f   :  { %700 = vsyncadd [#allocation3], 4294967232 }
  0x30   :  { %701 = dma.done.wait [#allocation6], 2048  }
  0x31   :  { %702 = vsyncadd [#allocation6], 4294965248 }
  0x32   :  { %703 = dma.done.wait [#allocation9], 1024  }
  0x33   :  { %704 = vsyncadd [#allocation9], 4294966272  ;;  %v713_v0 = vmov 0.0   ;;  %vm714_vm0 = vmmov 0   ;;  %v575_v1 = vld [vmem:[#allocation5 + $0x38] sm:$0xff]   ;;  %v576_v2 = vld [vmem:[#allocation5 + $0x30] sm:$0xff]  }
  0x34   :  { %506 = vmatprep.subr.bf16.mxu0 %v713_v0  ;;  %522 = vmatprep.mubr.msk.bf16.mxu0 %vm714_vm0, %v713_v0  ;;  %v577_v3 = vld [vmem:[#allocation5 + $0x28] sm:$0xff]   ;;  %v583_v4 = vld [vmem:[#allocation7 + $0x38] sm:$0xff]   ;;  %v578_v5 = vld [vmem:[#allocation5 + $0x20] sm:$0xff]  }
  0x35   :  { %526 = vmatprep.subr.bf16.mxu1 %v713_v0  ;;  %542 = vmatprep.mubr.msk.bf16.mxu1 %vm714_vm0, %v713_v0  ;;  %v584_v6 = vld [vmem:[#allocation7 + $0x30] sm:$0xff]   ;;  %v579_v7 = vld [vmem:[#allocation5 + $0x18] sm:$0xff]   ;;  %v585_v8 = vld [vmem:[#allocation7 + $0x28] sm:$0xff]  }
  0x36   :  { %507 = vmatpush3.bf16.msra.mxu0 %v575_v1  ;;  %527 = vmatpush3.bf16.msra.mxu1 %v583_v4  ;;  %v580_v9 = vld [vmem:[#allocation5 + $0x10] sm:$0xff]   ;;  %v586_v10 = vld [vmem:[#allocation7 + $0x20] sm:$0xff]   ;;  %v581_v11 = vld [vmem:[#allocation5 + $0x8] sm:$0xff]  }
  0x37   :  { %508 = vmatprep.subr.bf16.mxu0 %v713_v0  ;;  %528 = vmatprep.subr.bf16.mxu1 %v713_v0  ;;  %v587_v12 = vld [vmem:[#allocation7 + $0x18] sm:$0xff]   ;;  %v582_v13 = vld [vmem:[#allocation5] sm:$0xff]   ;;  %v588_v14 = vld [vmem:[#allocation7 + $0x10] sm:$0xff]  }
  0x38   :  { %v83_v15 = vld [vmem:[#allocation2] sm:$0xf]  ;;  %v589_v16 = vld [vmem:[#allocation7 + $0x8] sm:$0xff]   ;;  %v590_v17 = vld [vmem:[#allocation7] sm:$0xff]  }
  0x39   :  { %v591_v18 = vld [vmem:[#allocation8 + $0x38] sm:$0xff]   ;;  %v592_v19 = vld [vmem:[#allocation8 + $0x30] sm:$0xff]   ;;  %v593_v20 = vld [vmem:[#allocation8 + $0x28] sm:$0xff]   ;;  %v84_v43 = vunpack.c.l.bf16 %v83_v15 }
  0x3a   :  { %509 = vmatpush3.bf16.msra.mxu0 %v576_v2  ;;  %529 = vmatpush3.bf16.msra.mxu1 %v584_v6  ;;  %v594_v21 = vld [vmem:[#allocation8 + $0x20] sm:$0xff]   ;;  %v595_v22 = vld [vmem:[#allocation8 + $0x18] sm:$0xff]   ;;  %v596_v23 = vld [vmem:[#allocation8 + $0x10] sm:$0xff]  }
  0x3b   :  { %510 = vmatprep.subr.bf16.mxu0 %v713_v0  ;;  %530 = vmatprep.subr.bf16.mxu1 %v713_v0  ;;  %v452_v24 = vld [vmem:[%s831_s4] ss:$0 sm:$0xff]  ;;  %v597_v32 = vld [vmem:[#allocation8 + $0x8] sm:$0xff]   ;;  %v598_v33 = vld [vmem:[#allocation8] sm:$0xff]  }
  0x3c   :  { %v461_v34 = vld [vmem:[%s832_s5] ss:$0 sm:$0xff]  ;;  %s715_s5 = smov [#allocation10]  }
  0x3d   :  { %v470_v42 = vld [vmem:[%s833_s6] ss:$0 sm:$0xff]  ;;  %s437_s28 = sshll.u32 %s715_s5, 4  ;;  %s438_s28 = int_to_ptr.vmem [resolvable:$true] %s437_s28 }
  0x3e   :  { %511 = vmatpush3.bf16.msra.mxu0 %v577_v3  ;;  %531 = vmatpush3.bf16.msra.mxu1 %v585_v8  ;;  %s679_s29 = scalar_lea.vmem %s438_s28, 64  ;;  %p684_p7 = scmp.lt.s32.totalorder %s438_s28, %s438_s28 }
  0x3f   :  { %512 = vmatprep.subr.bf16.mxu0 %v713_v0  ;;  %532 = vmatprep.subr.bf16.mxu1 %v713_v0  ;;  %p680_p6 = scmp.ne.s32.totalorder %s438_s28, %s679_s29  ;;  %p685_p8 = scmp.lt.s32.totalorder %s679_s29, %s679_s29 }
  0x41   :  { %p686_p9 = por %p685_p8, %p684_p7 }
  0x42   :  { %513 = vmatpush3.bf16.msra.mxu0 %v578_v5  ;;  %533 = vmatpush3.bf16.msra.mxu1 %v586_v10 }
  0x43   :  { %514 = vmatprep.subr.bf16.mxu0 %v713_v0  ;;  %534 = vmatprep.subr.bf16.mxu1 %v713_v0  ;;  %p687_p10 = pnand %p686_p9, %p680_p6 }
  0x46   :  { %515 = vmatpush3.bf16.msra.mxu0 %v579_v7  ;;  %535 = vmatpush3.bf16.msra.mxu1 %v587_v12 }
  0x47   :  { %516 = vmatprep.subr.bf16.mxu0 %v713_v0  ;;  %536 = vmatprep.subr.bf16.mxu1 %v713_v0 }
  0x4a   :  { %517 = vmatpush3.bf16.msra.mxu0 %v580_v9  ;;  %537 = vmatpush3.bf16.msra.mxu1 %v588_v14 }
  0x4b   :  { %518 = vmatprep.subr.bf16.mxu0 %v713_v0  ;;  %538 = vmatprep.subr.bf16.mxu1 %v713_v0 }
  0x4e   :  { %519 = vmatpush3.bf16.msra.mxu0 %v581_v11  ;;  %539 = vmatpush3.bf16.msra.mxu1 %v589_v16 }
  0x4f   :  { %520 = vmatprep.subr.bf16.mxu0 %v713_v0  ;;  %540 = vmatprep.subr.bf16.mxu1 %v713_v0 }
  0x52   :  { %521 = vmatpush3.bf16.msra.mxu0 %v582_v13  ;;  %541 = vmatpush3.bf16.msra.mxu1 %v590_v17 }
  0x53   :  { %546 = vmatprep.subr.bf16.mxu0 %v713_v0 }
  0x55   :  { %523 = vmatmul.mubr.bf16.vlgmr.msra.gmra.mxu0 %v83_v15 }
  0x56   :  { %562 = vmatprep.mubr.msk.bf16.mxu0 %vm714_vm0, %v713_v0  ;;  %547 = vmatpush3.bf16.msra.mxu0 %v591_v18 }
  0x57   :  { %548 = vmatprep.subr.bf16.mxu0 %v713_v0 }
  0x5a   :  { %549 = vmatpush3.bf16.msra.mxu0 %v592_v19 }
  0x5b   :  { %550 = vmatprep.subr.bf16.mxu0 %v713_v0 }
  0x5e   :  { %551 = vmatpush3.bf16.msra.mxu0 %v593_v20 }
  0x5f   :  { %552 = vmatprep.subr.bf16.mxu0 %v713_v0 }
  0x62   :  { %553 = vmatpush3.bf16.msra.mxu0 %v594_v21 }
  0x63   :  { %554 = vmatprep.subr.bf16.mxu0 %v713_v0 }
  0x66   :  { %555 = vmatpush3.bf16.msra.mxu0 %v595_v22 }
  0x67   :  { %556 = vmatprep.subr.bf16.mxu0 %v713_v0 }
  0x6a   :  { %557 = vmatpush3.bf16.msra.mxu0 %v596_v23 }
  0x6b   :  { %558 = vmatprep.subr.bf16.mxu0 %v713_v0 }
  0x6e   :  { %559 = vmatpush3.bf16.msra.mxu0 %v597_v32 }
  0x6f   :  { %560 = vmatprep.subr.bf16.mxu0 %v713_v0 }
  0x72   :  { %561 = vmatpush3.bf16.msra.mxu0 %v598_v33 }
 0x115   :  { %v190_v25 = vpop.f32.mrf.mxu0 }
 0x116   :  { %v191_v26 = vadd.f32 %v452_v24, %v190_v25 }
 0x117   :  { %v524_v27 = vpop.f32.mrf.mxu0 }
 0x118   :  { %v196_v28 = vmax.f32 %v191_v26, 0.0 }
 0x119   :  { %v193_v29 = vpop.f32.mrf.mxu0 }
 0x11a   :  { %v197_v30 = vpack.c.bf16 %v196_v28, %v196_v28 }
 0x11b   :  { %v525_v31 = vpop.f32.mrf.mxu0 }
 0x11c   :  { %543 = vmatmul.mubr.bf16.vlgmr.msra.gmra.mxu1 %v197_v30 }
 0x1dc   :  { %v303_v35 = vpop.f32.mrf.mxu1 }
 0x1dd   :  { %v304_v36 = vadd.f32 %v461_v34, %v303_v35 }
 0x1de   :  { %v544_v37 = vpop.f32.mrf.mxu1 }
 0x1df   :  { %v309_v38 = vmax.f32 %v304_v36, 0.0 }
 0x1e0   :  { %v306_v39 = vpop.f32.mrf.mxu1 }
 0x1e1   :  { %v310_v40 = vpack.c.bf16 %v309_v38, %v309_v38 }
 0x1e2   :  { %v545_v41 = vpop.f32.mrf.mxu1 }
 0x1e3   :  { %563 = vmatmul.mubr.bf16.vlgmr.msra.gmra.mxu0 %v310_v40 }
 0x2a3   :  { %v416_v44 = vpop.f32.mrf.mxu0 }
 0x2a4   :  { %v417_v45 = vadd.f32 %v470_v42, %v416_v44 }
 0x2a5   :  { %v564_v46 = vpop.f32.mrf.mxu0 }
 0x2a6   :  { %v422_v47 = vpack.c.bf16 %v417_v45, %v417_v45  ;;  %v424_v48 = vsub.f32 %v417_v45, %v84_v43 }
 0x2a7   :  { %v419_v49 = vpop.f32.mrf.mxu0 }
 0x2a8   :  { %423 = vst [vmem:[#allocation10] sm:$0xf] %v422_v47  ;;  %v425_v50 = vmul.f32 %v424_v48, %v424_v48 }
 0x2a9   :  { %v565_v51 = vpop.f32.mrf.mxu0 }
 0x2aa   :  { %426 = vadd.xlane.f32.xlu0 %v425_v50 }
 0x2ab   :  { %690 = shalt.err (!%p687_p10)
}
 0x2ac   :  { %440 = dma.vmem_to_hbm [thread:$0]  %s438_s28, 64, %s834_s7, [#allocation4]   ;;  %vm429_vm1 = vcmask 7168  }
 0x333   :  { %v427_v52 = vpop.xlane.xlu0 %426 }
 0x334   :  { %v428_v53 = vmul.f32 0.03125, %v427_v52 }
 0x336   :  { %430 = vst.msk [vmem:[%s835_s8] sm:$0xff] %vm429_vm1, %v428_v53 }
 0x337   :  { %705 = dma.done.wait [#allocation4], 64  }
 0x338   :  { %706 = vsyncadd [#allocation4], 4294967232 }
 0x339   :  { %448 = vsyncpa [#allocation3], 1 }
 0x33a   :  { %449 = vsyncpa [#allocation6], 1 }
 0x33b   :  { %450 = vsyncpa [#allocation9], 1 }
 0x33c   :  { %451 = vsyncpa [#allocation4], 1 }

</bundles_post_ra>
